<compile_context>
chip_gen: v5e
topology: v5e:2x2
jax: 0.10.0
libtpu: 0.0.40
codegen_flags: <defaults>
</compile_context>

<pallas_src>
import jax
import jax.numpy as jnp
from jax.experimental import pallas as pl
from jax.experimental.pallas import tpu as pltpu

LANE = 128       # TPU lane width (last dim)
ROW_TILE = 16    # bf16 sublane packing: 16 rows per packed vreg tile


def _round_up(n, m):
    return ((n + m - 1) // m) * m


def _cdiv(a, b):
    return -(-a // b)


def _pad2(a, rows, cols):
    r, c = a.shape
    return jnp.pad(a, ((0, rows - r), (0, cols - c)))


# ----------------------------------------------------------------------------
# Kernel: one batch tile through the full 3-layer MLP (fused).
# ----------------------------------------------------------------------------
def actor_kernel(x_ref, w1_ref, b1_ref, w2_ref, b2_ref, w3_ref, b3_ref, o_ref):
    # linear1 + ReLU (bf16 operands on the MXU, f32 accumulate; f32 epilogue,
    # friendly to v5e's f32-only VPU).
    h1 = jnp.dot(x_ref[...], w1_ref[...], preferred_element_type=jnp.float32)
    h1 = jnp.maximum(h1 + b1_ref[...], 0.0)
    # dropout (eval mode) -> identity
    # linear2 + ReLU
    h2 = jnp.dot(h1.astype(w2_ref.dtype), w2_ref[...],
                 preferred_element_type=jnp.float32)
    h2 = jnp.maximum(h2 + b2_ref[...], 0.0)
    # dropout (eval mode) -> identity
    # linear3 (no activation)
    out = jnp.dot(h2.astype(w3_ref.dtype), w3_ref[...],
                  preferred_element_type=jnp.float32)
    o_ref[...] = (out + b3_ref[...]).astype(o_ref.dtype)


# ----------------------------------------------------------------------------
# One-time parameter preparation (hoisted out of the per-call path).
# ----------------------------------------------------------------------------
def prepare_params(w1, b1, w2, b2, w3, b3, *, param_dtype=jnp.bfloat16):
    """Zero-pad every operand to lane-dense (multiple-of-128) widths and cast
    matmul operands to bf16 ONCE. Zero padding is exact: padded hidden units
    get zero weights/bias -> ReLU(0)=0 and contribute nothing downstream;
    padded output columns are sliced off in the wrapper."""
    D, H = w1.shape
    A = w3.shape[1]
    D_p, H_p, A_p = (_round_up(d, LANE) for d in (D, H, A))
    padded = (
        _pad2(w1, D_p, H_p).astype(param_dtype),
        _pad2(b1, 1, H_p).astype(jnp.float32),
        _pad2(w2, H_p, H_p).astype(param_dtype),
        _pad2(b2, 1, H_p).astype(jnp.float32),
        _pad2(w3, H_p, A_p).astype(param_dtype),
        _pad2(b3, 1, A_p).astype(jnp.float32),
    )
    dims = dict(D=D, H=H, A=A, D_p=D_p, H_p=H_p, A_p=A_p)
    return padded, dims


def _choose_tb(B, H_p, block_b):
    """Batch tile: 16-row granularity, sized so the tail tile isn't mostly
    padding, capped for very large hidden sizes (v7x 64 MiB VMEM), and split
    into >=2 tiles when possible so the parallel axis engages both v7x TCs."""
    if H_p >= 2048:
        block_b = min(block_b, 256)
    if B <= ROW_TILE:
        return ROW_TILE                      # tiny batch: one tile, overhead-bound anyway
    n_tiles = max(2, _cdiv(B, block_b))
    return _round_up(_cdiv(B, n_tiles), ROW_TILE)


# ----------------------------------------------------------------------------
# Forward wrapper.
# ----------------------------------------------------------------------------
def actor_forward(x, padded_params, dims, *, block_b=512, out_dtype=jnp.float32):
    w1_p, b1_p, w2_p, b2_p, w3_p, b3_p = padded_params
    D, A = dims["D"], dims["A"]
    D_p, H_p, A_p = dims["D_p"], dims["H_p"], dims["A_p"]
    B = x.shape[0]
    assert x.shape[1] == D

    TB = _choose_tb(B, H_p, block_b)
    B_p = _round_up(B, TB)
    grid = (B_p // TB,)

    # Per-call wrapper work is limited to the activations.
    x_p = _pad2(x, B_p, D_p).astype(w1_p.dtype)

    in_itemsize = x_p.dtype.itemsize
    out_itemsize = jnp.dtype(out_dtype).itemsize
    w_itemsize = w1_p.dtype.itemsize
    wbytes = (D_p * H_p + H_p * H_p + H_p * A_p) * w_itemsize
    bbytes = (2 * H_p + A_p) * 4
    flops = 2 * B_p * (D_p * H_p + H_p * H_p + H_p * A_p)
    cost = pl.CostEstimate(
        flops=flops,
        transcendentals=0,
        bytes_accessed=wbytes + bbytes
        + B_p * D_p * in_itemsize + B_p * A_p * out_itemsize,
    )

    # VMEM budget: double-buffered x/out tiles + weights (assume worst-case 2
    # copies if single-buffering is unavailable) + f32 intermediates/casts.
    vmem_need = (2 * TB * D_p * in_itemsize + 2 * TB * A_p * out_itemsize
                 + 2 * wbytes + bbytes + 3 * TB * H_p * 4)
    vmem_limit = int(min(64 << 20, max(32 << 20, int(vmem_need * 1.25))))

    def build(single_buffer_weights):
        if single_buffer_weights:
            # Grid-invariant operands: single-buffered, one DMA, VMEM-resident.
            resident = lambda shape: pl.BlockSpec(
                shape, lambda i: (0, 0), pipeline_mode=pl.Buffered(1))
        else:
            resident = lambda shape: pl.BlockSpec(shape, lambda i: (0, 0))
        return pl.pallas_call(
            actor_kernel,
            out_shape=jax.ShapeDtypeStruct((B_p, A_p), out_dtype),
            grid=grid,
            in_specs=[
                pl.BlockSpec((TB, D_p), lambda i: (i, 0)),   # x: tiled over batch
                resident((D_p, H_p)), resident((1, H_p)),    # w1, b1
                resident((H_p, H_p)), resident((1, H_p)),    # w2, b2
                resident((H_p, A_p)), resident((1, A_p)),    # w3, b3
            ],
            out_specs=pl.BlockSpec((TB, A_p), lambda i: (i, 0)),
            compiler_params=pltpu.CompilerParams(
                dimension_semantics=("parallel",),            # batch-parallel (v7x 2 TCs)
                vmem_limit_bytes=vmem_limit,
            ),
            cost_estimate=cost,
        )

    args = (x_p, w1_p, b1_p, w2_p, b2_p, w3_p, b3_p)
    try:
        out_p = build(True)(*args)
    except Exception:
        # Fallback for JAX builds where pipeline_mode=pl.Buffered(1) on the
        # main pallas_call pipeline is unsupported.
        out_p = build(False)(*args)

    return out_p[:B, :A]


# ----------------------------------------------------------------------------
# Parameter init mirroring PyTorch nn.Linear defaults + uniform_(-init_w, init_w)
# on linear3.
# ----------------------------------------------------------------------------
def init_params(key, input_dim, action_dim, hidden_size, init_w=0.3):
    ks = jax.random.split(key, 6)

    def linear_init(kw, kb, fan_in, fan_out):
        bound = 1.0 / jnp.sqrt(jnp.float32(fan_in))
        w = jax.random.uniform(kw, (fan_in, fan_out), jnp.float32, -bound, bound)
        b = jax.random.uniform(kb, (1, fan_out), jnp.float32, -bound, bound)
        return w, b

    w1, b1 = linear_init(ks[0], ks[1], input_dim, hidden_size)
    w2, b2 = linear_init(ks[2], ks[3], hidden_size, hidden_size)
    w3 = jax.random.uniform(ks[4], (hidden_size, action_dim), jnp.float32,
                            -init_w, init_w)
    b3 = jax.random.uniform(ks[5], (1, action_dim), jnp.float32,
                            -init_w, init_w)
    return w1, b1, w2, b2, w3, b3


if __name__ == "__main__":
    key = jax.random.PRNGKey(0)
    k_x, k_p = jax.random.split(key)

    # Small shapes consistent with the module: state vector -> action vector.
    batch, input_dim, hidden_size, action_dim = 8, 32, 32, 8

    x = jax.random.normal(k_x, (batch, input_dim), jnp.float32)
    raw_params = init_params(k_p, input_dim, action_dim, hidden_size, init_w=0.3)

    # One-time pad + cast (hoisted out of the per-call path).
    padded_params, dims = prepare_params(*raw_params)

    out = actor_forward(x, padded_params, dims)
    out = jax.block_until_ready(out)

    # Pure-JAX reference with the same bf16-operand / f32-accumulate math
    # (eval-mode dropout = identity).
    w1, b1, w2, b2, w3, b3 = raw_params
    bf = jnp.bfloat16
    h1 = jnp.maximum(
        jnp.dot(x.astype(bf), w1.astype(bf),
                preferred_element_type=jnp.float32) + b1, 0.0)
    h2 = jnp.maximum(
        jnp.dot(h1.astype(bf), w2.astype(bf),
                preferred_element_type=jnp.float32) + b2, 0.0)
    ref = jnp.dot(h2.astype(bf), w3.astype(bf),
                  preferred_element_type=jnp.float32) + b3

    assert out.shape == (batch, action_dim)
    assert jnp.allclose(out, ref, atol=1e-2, rtol=1e-2), (
        float(jnp.max(jnp.abs(out - ref))))

    print("KERNEL_OK")
</pallas_src>

<mosaic_0001>
module attributes {stable_mosaic.version = 11 : i64} {
  func.func @actor_kernel(%arg0: i32, %arg1: memref<16x128xbf16, #tpu.memory_space<vmem>>, %arg2: memref<128x128xbf16, #tpu.memory_space<vmem>>, %arg3: memref<1x128xf32, #tpu.memory_space<vmem>>, %arg4: memref<128x128xbf16, #tpu.memory_space<vmem>>, %arg5: memref<1x128xf32, #tpu.memory_space<vmem>>, %arg6: memref<128x128xbf16, #tpu.memory_space<vmem>>, %arg7: memref<1x128xf32, #tpu.memory_space<vmem>>, %arg8: memref<16x128xf32, #tpu.memory_space<vmem>>) attributes {dimension_semantics = [#tpu.dimension_semantics<parallel>], iteration_bounds = array<i64: 1>, scalar_prefetch = 0 : i64, scratch_operands = 0 : i64, tpu.core_type = #tpu.core_type<tc>, window_params = [{transform_indices = @transform_0, window_bounds = array<i64: 16, 128>}, {pipeline_mode = #tpu.pipeline_mode<synchronous>, transform_indices = @transform_1, window_bounds = array<i64: 128, 128>}, {pipeline_mode = #tpu.pipeline_mode<synchronous>, transform_indices = @transform_2, window_bounds = array<i64: 1, 128>}, {pipeline_mode = #tpu.pipeline_mode<synchronous>, transform_indices = @transform_3, window_bounds = array<i64: 128, 128>}, {pipeline_mode = #tpu.pipeline_mode<synchronous>, transform_indices = @transform_4, window_bounds = array<i64: 1, 128>}, {pipeline_mode = #tpu.pipeline_mode<synchronous>, transform_indices = @transform_5, window_bounds = array<i64: 128, 128>}, {pipeline_mode = #tpu.pipeline_mode<synchronous>, transform_indices = @transform_6, window_bounds = array<i64: 1, 128>}, {transform_indices = @transform_7, window_bounds = array<i64: 16, 128>}]} {
    %c0 = arith.constant 0 : index
    %c0_0 = arith.constant 0 : index
    %0 = vector.load %arg1[%c0, %c0_0] : memref<16x128xbf16, #tpu.memory_space<vmem>>, vector<16x128xbf16>
    %c0_1 = arith.constant 0 : index
    %c0_2 = arith.constant 0 : index
    %1 = vector.load %arg2[%c0_1, %c0_2] : memref<128x128xbf16, #tpu.memory_space<vmem>>, vector<128x128xbf16>
    %cst = arith.constant dense<0.000000e+00> : vector<16x128xf32>
    %2 = tpu.matmul %0, %1, %cst {dimension_numbers = #tpu.dot_dimension_numbers<[1], [0], [0], [1], [0, 0, 1, 1], [], []>} : vector<16x128xbf16>, vector<128x128xbf16>, vector<16x128xf32> -> vector<16x128xf32>
    %c0_3 = arith.constant 0 : index
    %c0_4 = arith.constant 0 : index
    %3 = vector.load %arg3[%c0_3, %c0_4] : memref<1x128xf32, #tpu.memory_space<vmem>>, vector<1x128xf32>
    %4 = vector.broadcast %3 : vector<1x128xf32> to vector<16x128xf32>
    %5 = arith.addf %2, %4 : vector<16x128xf32>
    %cst_5 = arith.constant 0.000000e+00 : f32
    %6 = vector.broadcast %cst_5 : f32 to vector<16x128xf32>
    %7 = arith.maximumf %5, %6 : vector<16x128xf32>
    %8 = arith.truncf %7 : vector<16x128xf32> to vector<16x128xbf16>
    %c0_6 = arith.constant 0 : index
    %c0_7 = arith.constant 0 : index
    %9 = vector.load %arg4[%c0_6, %c0_7] : memref<128x128xbf16, #tpu.memory_space<vmem>>, vector<128x128xbf16>
    %cst_8 = arith.constant dense<0.000000e+00> : vector<16x128xf32>
    %10 = tpu.matmul %8, %9, %cst_8 {dimension_numbers = #tpu.dot_dimension_numbers<[1], [0], [0], [1], [0, 0, 1, 1], [], []>} : vector<16x128xbf16>, vector<128x128xbf16>, vector<16x128xf32> -> vector<16x128xf32>
    %c0_9 = arith.constant 0 : index
    %c0_10 = arith.constant 0 : index
    %11 = vector.load %arg5[%c0_9, %c0_10] : memref<1x128xf32, #tpu.memory_space<vmem>>, vector<1x128xf32>
    %12 = vector.broadcast %11 : vector<1x128xf32> to vector<16x128xf32>
    %13 = arith.addf %10, %12 : vector<16x128xf32>
    %cst_11 = arith.constant 0.000000e+00 : f32
    %14 = vector.broadcast %cst_11 : f32 to vector<16x128xf32>
    %15 = arith.maximumf %13, %14 : vector<16x128xf32>
    %16 = arith.truncf %15 : vector<16x128xf32> to vector<16x128xbf16>
    %c0_12 = arith.constant 0 : index
    %c0_13 = arith.constant 0 : index
    %17 = vector.load %arg6[%c0_12, %c0_13] : memref<128x128xbf16, #tpu.memory_space<vmem>>, vector<128x128xbf16>
    %cst_14 = arith.constant dense<0.000000e+00> : vector<16x128xf32>
    %18 = tpu.matmul %16, %17, %cst_14 {dimension_numbers = #tpu.dot_dimension_numbers<[1], [0], [0], [1], [0, 0, 1, 1], [], []>} : vector<16x128xbf16>, vector<128x128xbf16>, vector<16x128xf32> -> vector<16x128xf32>
    %c0_15 = arith.constant 0 : index
    %c0_16 = arith.constant 0 : index
    %19 = vector.load %arg7[%c0_15, %c0_16] : memref<1x128xf32, #tpu.memory_space<vmem>>, vector<1x128xf32>
    %20 = vector.broadcast %19 : vector<1x128xf32> to vector<16x128xf32>
    %21 = arith.addf %18, %20 : vector<16x128xf32>
    %c0_17 = arith.constant 0 : index
    %c0_18 = arith.constant 0 : index
    %22 = vector.load %arg8[%c0_17, %c0_18] : memref<16x128xf32, #tpu.memory_space<vmem>>, vector<16x128xf32>
    tpu.vector_store %arg8[%c0_17, %c0_18], %21 {strides = array<i32>} : memref<16x128xf32, #tpu.memory_space<vmem>>, vector<16x128xf32>,
    return
  }
  func.func @transform_0(%arg0: i32) -> (i32, i32) {
    %c0_i32 = arith.constant 0 : i32
    %c0_i32_0 = arith.constant 0 : i32
    return %arg0, %c0_i32 : i32, i32
  }
  func.func @transform_1(%arg0: i32) -> (i32, i32) {
    %c0_i32 = arith.constant 0 : i32
    %c0_i32_0 = arith.constant 0 : i32
    %c0_i32_1 = arith.constant 0 : i32
    return %c0_i32, %c0_i32_0 : i32, i32
  }
  func.func @transform_2(%arg0: i32) -> (i32, i32) {
    %c0_i32 = arith.constant 0 : i32
    %c0_i32_0 = arith.constant 0 : i32
    %c0_i32_1 = arith.constant 0 : i32
    return %c0_i32, %c0_i32_0 : i32, i32
  }
  func.func @transform_3(%arg0: i32) -> (i32, i32) {
    %c0_i32 = arith.constant 0 : i32
    %c0_i32_0 = arith.constant 0 : i32
    %c0_i32_1 = arith.constant 0 : i32
    return %c0_i32, %c0_i32_0 : i32, i32
  }
  func.func @transform_4(%arg0: i32) -> (i32, i32) {
    %c0_i32 = arith.constant 0 : i32
    %c0_i32_0 = arith.constant 0 : i32
    %c0_i32_1 = arith.constant 0 : i32
    return %c0_i32, %c0_i32_0 : i32, i32
  }
  func.func @transform_5(%arg0: i32) -> (i32, i32) {
    %c0_i32 = arith.constant 0 : i32
    %c0_i32_0 = arith.constant 0 : i32
    %c0_i32_1 = arith.constant 0 : i32
    return %c0_i32, %c0_i32_0 : i32, i32
  }
  func.func @transform_6(%arg0: i32) -> (i32, i32) {
    %c0_i32 = arith.constant 0 : i32
    %c0_i32_0 = arith.constant 0 : i32
    %c0_i32_1 = arith.constant 0 : i32
    return %c0_i32, %c0_i32_0 : i32, i32
  }
  func.func @transform_7(%arg0: i32) -> (i32, i32) {
    %c0_i32 = arith.constant 0 : i32
    %c0_i32_0 = arith.constant 0 : i32
    return %arg0, %c0_i32 : i32, i32
  }
}

module attributes {stable_mosaic.version = 11 : i64} {
  func.func @actor_kernel(%arg0: i32, %arg1: memref<16x128xbf16, #tpu.memory_space<vmem>>, %arg2: memref<128x128xbf16, #tpu.memory_space<vmem>>, %arg3: memref<1x128xf32, #tpu.memory_space<vmem>>, %arg4: memref<128x128xbf16, #tpu.memory_space<vmem>>, %arg5: memref<1x128xf32, #tpu.memory_space<vmem>>, %arg6: memref<128x128xbf16, #tpu.memory_space<vmem>>, %arg7: memref<1x128xf32, #tpu.memory_space<vmem>>, %arg8: memref<16x128xf32, #tpu.memory_space<vmem>>) attributes {dimension_semantics = [#tpu.dimension_semantics<parallel>], iteration_bounds = array<i64: 1>, scalar_prefetch = 0 : i64, scratch_operands = 0 : i64, tpu.core_type = #tpu.core_type<tc>, window_params = [{transform_indices = @transform_0, window_bounds = array<i64: 16, 128>}, {pipeline_mode = #tpu.pipeline_mode<synchronous>, transform_indices = @transform_1, window_bounds = array<i64: 128, 128>}, {pipeline_mode = #tpu.pipeline_mode<synchronous>, transform_indices = @transform_2, window_bounds = array<i64: 1, 128>}, {pipeline_mode = #tpu.pipeline_mode<synchronous>, transform_indices = @transform_3, window_bounds = array<i64: 128, 128>}, {pipeline_mode = #tpu.pipeline_mode<synchronous>, transform_indices = @transform_4, window_bounds = array<i64: 1, 128>}, {pipeline_mode = #tpu.pipeline_mode<synchronous>, transform_indices = @transform_5, window_bounds = array<i64: 128, 128>}, {pipeline_mode = #tpu.pipeline_mode<synchronous>, transform_indices = @transform_6, window_bounds = array<i64: 1, 128>}, {transform_indices = @transform_7, window_bounds = array<i64: 16, 128>}]} {
    %c0 = arith.constant 0 : index
    %c0_0 = arith.constant 0 : index
    %0 = vector.load %arg1[%c0, %c0_0] : memref<16x128xbf16, #tpu.memory_space<vmem>>, vector<16x128xbf16>
    %c0_1 = arith.constant 0 : index
    %c0_2 = arith.constant 0 : index
    %1 = vector.load %arg2[%c0_1, %c0_2] : memref<128x128xbf16, #tpu.memory_space<vmem>>, vector<128x128xbf16>
    %cst = arith.constant dense<0.000000e+00> : vector<16x128xf32>
    %2 = tpu.matmul %0, %1, %cst {dimension_numbers = #tpu.dot_dimension_numbers<[1], [0], [0], [1], [0, 0, 1, 1], [], []>} : vector<16x128xbf16>, vector<128x128xbf16>, vector<16x128xf32> -> vector<16x128xf32>
    %c0_3 = arith.constant 0 : index
    %c0_4 = arith.constant 0 : index
    %3 = vector.load %arg3[%c0_3, %c0_4] : memref<1x128xf32, #tpu.memory_space<vmem>>, vector<1x128xf32>
    %4 = vector.broadcast %3 : vector<1x128xf32> to vector<16x128xf32>
    %5 = arith.addf %2, %4 : vector<16x128xf32>
    %cst_5 = arith.constant 0.000000e+00 : f32
    %6 = vector.broadcast %cst_5 : f32 to vector<16x128xf32>
    %7 = arith.maximumf %5, %6 : vector<16x128xf32>
    %8 = arith.truncf %7 : vector<16x128xf32> to vector<16x128xbf16>
    %c0_6 = arith.constant 0 : index
    %c0_7 = arith.constant 0 : index
    %9 = vector.load %arg4[%c0_6, %c0_7] : memref<128x128xbf16, #tpu.memory_space<vmem>>, vector<128x128xbf16>
    %cst_8 = arith.constant dense<0.000000e+00> : vector<16x128xf32>
    %10 = tpu.matmul %8, %9, %cst_8 {dimension_numbers = #tpu.dot_dimension_numbers<[1], [0], [0], [1], [0, 0, 1, 1], [], []>} : vector<16x128xbf16>, vector<128x128xbf16>, vector<16x128xf32> -> vector<16x128xf32>
    %c0_9 = arith.constant 0 : index
    %c0_10 = arith.constant 0 : index
    %11 = vector.load %arg5[%c0_9, %c0_10] : memref<1x128xf32, #tpu.memory_space<vmem>>, vector<1x128xf32>
    %12 = vector.broadcast %11 : vector<1x128xf32> to vector<16x128xf32>
    %13 = arith.addf %10, %12 : vector<16x128xf32>
    %cst_11 = arith.constant 0.000000e+00 : f32
    %14 = vector.broadcast %cst_11 : f32 to vector<16x128xf32>
    %15 = arith.maximumf %13, %14 : vector<16x128xf32>
    %16 = arith.truncf %15 : vector<16x128xf32> to vector<16x128xbf16>
    %c0_12 = arith.constant 0 : index
    %c0_13 = arith.constant 0 : index
    %17 = vector.load %arg6[%c0_12, %c0_13] : memref<128x128xbf16, #tpu.memory_space<vmem>>, vector<128x128xbf16>
    %cst_14 = arith.constant dense<0.000000e+00> : vector<16x128xf32>
    %18 = tpu.matmul %16, %17, %cst_14 {dimension_numbers = #tpu.dot_dimension_numbers<[1], [0], [0], [1], [0, 0, 1, 1], [], []>} : vector<16x128xbf16>, vector<128x128xbf16>, vector<16x128xf32> -> vector<16x128xf32>
    %c0_15 = arith.constant 0 : index
    %c0_16 = arith.constant 0 : index
    %19 = vector.load %arg7[%c0_15, %c0_16] : memref<1x128xf32, #tpu.memory_space<vmem>>, vector<1x128xf32>
    %20 = vector.broadcast %19 : vector<1x128xf32> to vector<16x128xf32>
    %21 = arith.addf %18, %20 : vector<16x128xf32>
    %c0_17 = arith.constant 0 : index
    %c0_18 = arith.constant 0 : index
    %22 = vector.load %arg8[%c0_17, %c0_18] : memref<16x128xf32, #tpu.memory_space<vmem>>, vector<16x128xf32>
    tpu.vector_store %arg8[%c0_17, %c0_18], %21 {strides = array<i32>} : memref<16x128xf32, #tpu.memory_space<vmem>>, vector<16x128xf32>,
    return
  }
  func.func @transform_0(%arg0: i32) -> (i32, i32) {
    %c0_i32 = arith.constant 0 : i32
    %c0_i32_0 = arith.constant 0 : i32
    return %arg0, %c0_i32 : i32, i32
  }
  func.func @transform_1(%arg0: i32) -> (i32, i32) {
    %c0_i32 = arith.constant 0 : i32
    %c0_i32_0 = arith.constant 0 : i32
    %c0_i32_1 = arith.constant 0 : i32
    return %c0_i32, %c0_i32_0 : i32, i32
  }
  func.func @transform_2(%arg0: i32) -> (i32, i32) {
    %c0_i32 = arith.constant 0 : i32
    %c0_i32_0 = arith.constant 0 : i32
    %c0_i32_1 = arith.constant 0 : i32
    return %c0_i32, %c0_i32_0 : i32, i32
  }
  func.func @transform_3(%arg0: i32) -> (i32, i32) {
    %c0_i32 = arith.constant 0 : i32
    %c0_i32_0 = arith.constant 0 : i32
    %c0_i32_1 = arith.constant 0 : i32
    return %c0_i32, %c0_i32_0 : i32, i32
  }
  func.func @transform_4(%arg0: i32) -> (i32, i32) {
    %c0_i32 = arith.constant 0 : i32
    %c0_i32_0 = arith.constant 0 : i32
    %c0_i32_1 = arith.constant 0 : i32
    return %c0_i32, %c0_i32_0 : i32, i32
  }
  func.func @transform_5(%arg0: i32) -> (i32, i32) {
    %c0_i32 = arith.constant 0 : i32
    %c0_i32_0 = arith.constant 0 : i32
    %c0_i32_1 = arith.constant 0 : i32
    return %c0_i32, %c0_i32_0 : i32, i32
  }
  func.func @transform_6(%arg0: i32) -> (i32, i32) {
    %c0_i32 = arith.constant 0 : i32
    %c0_i32_0 = arith.constant 0 : i32
    %c0_i32_1 = arith.constant 0 : i32
    return %c0_i32, %c0_i32_0 : i32, i32
  }
  func.func @transform_7(%arg0: i32) -> (i32, i32) {
    %c0_i32 = arith.constant 0 : i32
    %c0_i32_0 = arith.constant 0 : i32
    return %arg0, %c0_i32 : i32, i32
  }
}

</mosaic_0001>

<bundles_post_ra>
// kernel: tpu_custom_call.1
= control target key start
LH: loop header
LB: loop body
LE: loop exit
PB: predicated region body
PF: predicated region fallthrough
CT: control target
= control target key end

     0   :  { %12 = vsyncpa [#allocation3], 0  ;;  %s711_s0 = inlined_call_operand.hbm [shape: bf16[16,128], index: 0, kind: input, shape index: {}]   ;;  %s712_s1 = inlined_call_operand.hbm [shape: bf16[128,128], index: 1, kind: input, shape index: {}]   ;;  %s713_s2 = inlined_call_operand.vmem [shape: f32[1,128], index: 2, kind: input, shape index: {}]   ;;  %s714_s3 = inlined_call_operand.hbm [shape: bf16[128,128], index: 3, kind: input, shape index: {}]   ;;  %s715_s4 = inlined_call_operand.vmem [shape: f32[1,128], index: 4, kind: input, shape index: {}]   ;;  %s716_s5 = inlined_call_operand.hbm [shape: bf16[128,128], index: 5, kind: input, shape index: {}]   ;;  %s717_s6 = inlined_call_operand.vmem [shape: f32[1,128], index: 6, kind: input, shape index: {}]   ;;  %s718_s7 = inlined_call_operand.hbm [shape: f32[16,128], index: 7, kind: output, shape index: {}]  }
   0x1   :  { %13 = vsyncpa [#allocation6], 0 }
   0x2   :  { %14 = vsyncpa [#allocation9], 0 }
   0x3   :  { %15 = vsyncpa [#allocation4], 0  ;;  %s33_s26 = sshll.u32 %s712_s1, 4  ;;  %s638_s27 = smov [#allocation5]   ;;  %s34_s26 = int_to_ptr.hbm [resolvable:$true] %s33_s26 }
   0x4   :  { %s35_s28 = sshll.u32 %s638_s27, 4  ;;  %s20_s8 = sshll.u32 %s711_s0, 4  ;;  %s36_s28 = int_to_ptr.vmem [resolvable:$true] %s35_s28  ;;  %s21_s8 = int_to_ptr.hbm [resolvable:$true] %s20_s8 }
   0x5   :  { %s639_s9 = smov 64   ;;  %s640_s10 = smov 4  }
   0x6   :  { %41 = dma.hbm_to_vmem [thread:$0]  %s34_s26, 1024, %s36_s28, [#allocation6], %s639_s9, %s639_s9, %s640_s10  }
   0x7   :  { %s641_s11 = smov [#allocation2]   ;;  %s48_s15 = sshll.u32 %s714_s3, 4  ;;  %s49_s15 = int_to_ptr.hbm [resolvable:$true] %s48_s15 }
   0x8   :  { %s22_s12 = sshll.u32 %s641_s11, 4  ;;  %s63_s17 = sshll.u32 %s716_s5, 4  ;;  %s23_s12 = int_to_ptr.vmem [resolvable:$true] %s22_s12  ;;  %s64_s17 = int_to_ptr.hbm [resolvable:$true] %s63_s17 }
   0x9   :  { %28 = dma.hbm_to_vmem [thread:$0]  %s21_s8, 128, %s23_s12, [#allocation3], %s639_s9, %s639_s9, %s640_s10  }
   0xa   :  { %s642_s18 = smov [#allocation7]   ;;  %s643_s0 = smov [#allocation8]  }
   0xb   :  { %s50_s19 = sshll.u32 %s642_s18, 4  ;;  %s65_s20 = sshll.u32 %s643_s0, 4  ;;  %s51_s19 = int_to_ptr.vmem [resolvable:$true] %s50_s19  ;;  %s66_s20 = int_to_ptr.vmem [resolvable:$true] %s65_s20 }
   0xc   :  { %56 = dma.hbm_to_vmem [thread:$0]  %s49_s15, 1024, %s51_s19, [#allocation6], %s639_s9, %s639_s9, %s640_s10  }
   0xd   :  { %71 = dma.hbm_to_vmem [thread:$0]  %s64_s17, 1024, %s66_s20, [#allocation9], %s639_s9, %s639_s9, %s640_s10  }
   0xe   :  { %630 = dma.done.wait [#allocation3], 128  }
   0xf   :  { %631 = vsyncadd [#allocation3], 4294967168 }
  0x10   :  { %632 = dma.done.wait [#allocation6], 2048  }
  0x11   :  { %633 = vsyncadd [#allocation6], 4294965248 }
  0x12   :  { %634 = dma.done.wait [#allocation9], 1024  }
  0x13   :  { %635 = vsyncadd [#allocation9], 4294966272  ;;  %v481_v0 = vld [vmem:[#allocation5 + $0x38] sm:$0xff]  ;;  %v480_v1 = vld [vmem:[#allocation5 + $0x30] sm:$0xff]  ;;  %s644_s24 = smov [#allocation10]   ;;  %s645_s28 = smov 128  }
  0x14   :  { %166 = vmatpush.bf16.msra.mxu0 %v481_v0  ;;  %v489_v2 = vld [vmem:[#allocation7 + $0x38] sm:$0xff]  ;;  %v488_v3 = vld [vmem:[#allocation7 + $0x30] sm:$0xff]  ;;  %v479_v4 = vld [vmem:[#allocation5 + $0x28] sm:$0xff]  ;;  %s356_s25 = sshll.u32 %s644_s24, 4  ;;  %s646_s29 = smov 8   ;;  %s357_s25 = int_to_ptr.vmem [resolvable:$true] %s356_s25 }
  0x15   :  { %251 = vmatpush.bf16.msra.mxu1 %v489_v2  ;;  %v487_v5 = vld [vmem:[#allocation7 + $0x28] sm:$0xff]  ;;  %v478_v6 = vld [vmem:[#allocation5 + $0x20] sm:$0xff]  ;;  %v477_v8 = vld [vmem:[#allocation5 + $0x18] sm:$0xff] }
  0x16   :  { %v486_v7 = vld [vmem:[#allocation7 + $0x20] sm:$0xff]  ;;  %v476_v9 = vld [vmem:[#allocation5 + $0x10] sm:$0xff]  ;;  %v475_v10 = vld [vmem:[#allocation5 + $0x8] sm:$0xff] }
  0x17   :  { %v474_v11 = vld [vmem:[#allocation5] sm:$0xff]  ;;  %v473_v12 = vld [vmem:[#allocation2] sm:$0xff]  ;;  %v484_v14 = vld [vmem:[#allocation7 + $0x10] sm:$0xff] }
  0x18   :  { %167 = vmatpush.bf16.msra.mxu0 %v480_v1  ;;  %v485_v13 = vld [vmem:[#allocation7 + $0x18] sm:$0xff]  ;;  %v483_v15 = vld [vmem:[#allocation7 + $0x8] sm:$0xff]  ;;  %v482_v16 = vld [vmem:[#allocation7] sm:$0xff] }
  0x19   :  { %252 = vmatpush.bf16.msra.mxu1 %v488_v3  ;;  %v497_v17 = vld [vmem:[#allocation8 + $0x38] sm:$0xff]  ;;  %v496_v18 = vld [vmem:[#allocation8 + $0x30] sm:$0xff]  ;;  %v495_v19 = vld [vmem:[#allocation8 + $0x28] sm:$0xff] }
  0x1a   :  { %336 = vmatpush.bf16.msra.mxu2 %v497_v17  ;;  %v494_v20 = vld [vmem:[#allocation8 + $0x20] sm:$0xff]  ;;  %v507_v22 = vld [vmem:[%s713_s2] ss:$0 sm:$0xff]  ;;  %v492_v30 = vld [vmem:[#allocation8 + $0x10] sm:$0xff] }
  0x1b   :  { %v493_v29 = vld [vmem:[#allocation8 + $0x18] sm:$0xff]  ;;  %v491_v31 = vld [vmem:[#allocation8 + $0x8] sm:$0xff]  ;;  %v490_v32 = vld [vmem:[#allocation8] sm:$0xff] }
  0x1c   :  { %168 = vmatpush.bf16.msra.mxu0 %v479_v4  ;;  %v508_v34 = vld [vmem:[%s715_s4] ss:$0 sm:$0xff]  ;;  %s358_s4 = sshll.u32 %s718_s7, 4  ;;  %s359_s4 = int_to_ptr.hbm [resolvable:$true] %s358_s4 }
  0x1d   :  { %253 = vmatpush.bf16.msra.mxu1 %v487_v5  ;;  %v509_v41 = vld [vmem:[%s717_s6] ss:$0 sm:$0xff] }
  0x1e   :  { %337 = vmatpush.bf16.msra.mxu2 %v496_v18 }
  0x20   :  { %169 = vmatpush.bf16.msra.mxu0 %v478_v6 }
  0x21   :  { %254 = vmatpush.bf16.msra.mxu1 %v486_v7 }
  0x22   :  { %338 = vmatpush.bf16.msra.mxu2 %v495_v19 }
  0x24   :  { %170 = vmatpush.bf16.msra.mxu0 %v477_v8 }
  0x25   :  { %255 = vmatpush.bf16.msra.mxu1 %v485_v13 }
  0x26   :  { %339 = vmatpush.bf16.msra.mxu2 %v494_v20 }
  0x28   :  { %171 = vmatpush.bf16.msra.mxu0 %v476_v9 }
  0x29   :  { %256 = vmatpush.bf16.msra.mxu1 %v484_v14 }
  0x2a   :  { %340 = vmatpush.bf16.msra.mxu2 %v493_v29 }
  0x2c   :  { %172 = vmatpush.bf16.msra.mxu0 %v475_v10 }
  0x2d   :  { %257 = vmatpush.bf16.msra.mxu1 %v483_v15 }
  0x2e   :  { %341 = vmatpush.bf16.msra.mxu2 %v492_v30 }
  0x30   :  { %173 = vmatpush.bf16.msra.mxu0 %v474_v11 }
  0x31   :  { %258 = vmatpush.bf16.msra.mxu1 %v482_v16 }
  0x32   :  { %342 = vmatpush.bf16.msra.mxu2 %v491_v31 }
  0x33   :  { %174 = vmatmul.bf16.vlgmr.msra.gmra.mxu0 %v473_v12 }
  0x36   :  { %343 = vmatpush.bf16.msra.mxu2 %v490_v32 }
  0xb0   :  { %v175_v21 = vpop.f32.mrf.mxu0 }
  0xb1   :  { %v176_v23 = vadd.f32 %v507_v22, %v175_v21 }
  0xb3   :  { %v180_v26 = vmax.f32 %v176_v23, 0.0 }
  0xb8   :  { %v177_v24 = vpop.f32.mrf.mxu0 }
  0xb9   :  { %v178_v25 = vadd.f32 %v507_v22, %v177_v24 }
  0xbb   :  { %v181_v27 = vmax.f32 %v178_v25, 0.0 }
  0xbd   :  { %v182_v28 = vpack.c.bf16 %v181_v27, %v180_v26 }
  0xbf   :  { %259 = vmatmul.bf16.vlgmr.msra.gmra.mxu1 %v182_v28 }
 0x13c   :  { %v260_v33 = vpop.f32.mrf.mxu1 }
 0x13d   :  { %v261_v35 = vadd.f32 %v508_v34, %v260_v33 }
 0x13f   :  { %v265_v38 = vmax.f32 %v261_v35, 0.0 }
 0x144   :  { %v262_v36 = vpop.f32.mrf.mxu1 }
 0x145   :  { %v263_v37 = vadd.f32 %v508_v34, %v262_v36 }
 0x147   :  { %v266_v39 = vmax.f32 %v263_v37, 0.0 }
 0x149   :  { %v267_v40 = vpack.c.bf16 %v266_v39, %v265_v38 }
 0x14b   :  { %344 = vmatmul.bf16.vlgmr.msra.gmra.mxu2 %v267_v40 }
 0x1ce   :  { %v345_v42 = vpop.f32.mrf.mxu2 }
 0x1cf   :  { %v346_v43 = vadd.f32 %v509_v41, %v345_v42 }
 0x1d1   :  { %350 = vst [vmem:[#allocation10] sm:$0xff] %v346_v43 }
 0x1d6   :  { %v347_v44 = vpop.f32.mrf.mxu2 }
 0x1d7   :  { %v348_v45 = vadd.f32 %v509_v41, %v347_v44 }
 0x1d9   :  { %351 = vst [vmem:[#allocation10 + $0x8] sm:$0xff] %v348_v45 }
 0x1da   :  { %364 = dma.vmem_to_hbm [thread:$0]  %s357_s25, 256, %s359_s4, [#allocation4], %s645_s28, %s645_s28, %s646_s29  }
 0x1db   :  { %636 = dma.done.wait [#allocation4], 256  }
 0x1dc   :  { %637 = vsyncadd [#allocation4], 4294967040 }
 0x1dd   :  { %369 = vsyncpa [#allocation3], 1 }
 0x1de   :  { %370 = vsyncpa [#allocation6], 1 }
 0x1df   :  { %371 = vsyncpa [#allocation9], 1 }
 0x1e0   :  { %372 = vsyncpa [#allocation4], 1 }

// kernel: tpu_custom_call.1
= control target key start
LH: loop header
LB: loop body
LE: loop exit
PB: predicated region body
PF: predicated region fallthrough
CT: control target
= control target key end

     0   :  { %12 = vsyncpa [#allocation3], 0  ;;  %s711_s0 = inlined_call_operand.hbm [shape: bf16[16,128], index: 0, kind: input, shape index: {}]   ;;  %s712_s1 = inlined_call_operand.hbm [shape: bf16[128,128], index: 1, kind: input, shape index: {}]   ;;  %s713_s2 = inlined_call_operand.vmem [shape: f32[1,128], index: 2, kind: input, shape index: {}]   ;;  %s714_s3 = inlined_call_operand.hbm [shape: bf16[128,128], index: 3, kind: input, shape index: {}]   ;;  %s715_s4 = inlined_call_operand.vmem [shape: f32[1,128], index: 4, kind: input, shape index: {}]   ;;  %s716_s5 = inlined_call_operand.hbm [shape: bf16[128,128], index: 5, kind: input, shape index: {}]   ;;  %s717_s6 = inlined_call_operand.vmem [shape: f32[1,128], index: 6, kind: input, shape index: {}]   ;;  %s718_s7 = inlined_call_operand.hbm [shape: f32[16,128], index: 7, kind: output, shape index: {}]  }
   0x1   :  { %13 = vsyncpa [#allocation6], 0 }
   0x2   :  { %14 = vsyncpa [#allocation9], 0 }
   0x3   :  { %15 = vsyncpa [#allocation4], 0  ;;  %s33_s26 = sshll.u32 %s712_s1, 4  ;;  %s638_s27 = smov [#allocation5]   ;;  %s34_s26 = int_to_ptr.hbm [resolvable:$true] %s33_s26 }
   0x4   :  { %s35_s28 = sshll.u32 %s638_s27, 4  ;;  %s20_s8 = sshll.u32 %s711_s0, 4  ;;  %s36_s28 = int_to_ptr.vmem [resolvable:$true] %s35_s28  ;;  %s21_s8 = int_to_ptr.hbm [resolvable:$true] %s20_s8 }
   0x5   :  { %s639_s9 = smov 64   ;;  %s640_s10 = smov 4  }
   0x6   :  { %41 = dma.hbm_to_vmem [thread:$0]  %s34_s26, 1024, %s36_s28, [#allocation6], %s639_s9, %s639_s9, %s640_s10  }
   0x7   :  { %s641_s11 = smov [#allocation2]   ;;  %s48_s15 = sshll.u32 %s714_s3, 4  ;;  %s49_s15 = int_to_ptr.hbm [resolvable:$true] %s48_s15 }
   0x8   :  { %s22_s12 = sshll.u32 %s641_s11, 4  ;;  %s63_s17 = sshll.u32 %s716_s5, 4  ;;  %s23_s12 = int_to_ptr.vmem [resolvable:$true] %s22_s12  ;;  %s64_s17 = int_to_ptr.hbm [resolvable:$true] %s63_s17 }
   0x9   :  { %28 = dma.hbm_to_vmem [thread:$0]  %s21_s8, 128, %s23_s12, [#allocation3], %s639_s9, %s639_s9, %s640_s10  }
   0xa   :  { %s642_s18 = smov [#allocation7]   ;;  %s643_s0 = smov [#allocation8]  }
   0xb   :  { %s50_s19 = sshll.u32 %s642_s18, 4  ;;  %s65_s20 = sshll.u32 %s643_s0, 4  ;;  %s51_s19 = int_to_ptr.vmem [resolvable:$true] %s50_s19  ;;  %s66_s20 = int_to_ptr.vmem [resolvable:$true] %s65_s20 }
   0xc   :  { %56 = dma.hbm_to_vmem [thread:$0]  %s49_s15, 1024, %s51_s19, [#allocation6], %s639_s9, %s639_s9, %s640_s10  }
   0xd   :  { %71 = dma.hbm_to_vmem [thread:$0]  %s64_s17, 1024, %s66_s20, [#allocation9], %s639_s9, %s639_s9, %s640_s10  }
   0xe   :  { %630 = dma.done.wait [#allocation3], 128  }
   0xf   :  { %631 = vsyncadd [#allocation3], 4294967168 }
  0x10   :  { %632 = dma.done.wait [#allocation6], 2048  }
  0x11   :  { %633 = vsyncadd [#allocation6], 4294965248 }
  0x12   :  { %634 = dma.done.wait [#allocation9], 1024  }
  0x13   :  { %635 = vsyncadd [#allocation9], 4294966272  ;;  %v481_v0 = vld [vmem:[#allocation5 + $0x38] sm:$0xff]  ;;  %v480_v1 = vld [vmem:[#allocation5 + $0x30] sm:$0xff]  ;;  %s644_s24 = smov [#allocation10]   ;;  %s645_s28 = smov 128  }
  0x14   :  { %166 = vmatpush.bf16.msra.mxu0 %v481_v0  ;;  %v489_v2 = vld [vmem:[#allocation7 + $0x38] sm:$0xff]  ;;  %v488_v3 = vld [vmem:[#allocation7 + $0x30] sm:$0xff]  ;;  %v479_v4 = vld [vmem:[#allocation5 + $0x28] sm:$0xff]  ;;  %s356_s25 = sshll.u32 %s644_s24, 4  ;;  %s646_s29 = smov 8   ;;  %s357_s25 = int_to_ptr.vmem [resolvable:$true] %s356_s25 }
  0x15   :  { %251 = vmatpush.bf16.msra.mxu1 %v489_v2  ;;  %v487_v5 = vld [vmem:[#allocation7 + $0x28] sm:$0xff]  ;;  %v478_v6 = vld [vmem:[#allocation5 + $0x20] sm:$0xff]  ;;  %v477_v8 = vld [vmem:[#allocation5 + $0x18] sm:$0xff] }
  0x16   :  { %v486_v7 = vld [vmem:[#allocation7 + $0x20] sm:$0xff]  ;;  %v476_v9 = vld [vmem:[#allocation5 + $0x10] sm:$0xff]  ;;  %v475_v10 = vld [vmem:[#allocation5 + $0x8] sm:$0xff] }
  0x17   :  { %v474_v11 = vld [vmem:[#allocation5] sm:$0xff]  ;;  %v473_v12 = vld [vmem:[#allocation2] sm:$0xff]  ;;  %v484_v14 = vld [vmem:[#allocation7 + $0x10] sm:$0xff] }
  0x18   :  { %167 = vmatpush.bf16.msra.mxu0 %v480_v1  ;;  %v485_v13 = vld [vmem:[#allocation7 + $0x18] sm:$0xff]  ;;  %v483_v15 = vld [vmem:[#allocation7 + $0x8] sm:$0xff]  ;;  %v482_v16 = vld [vmem:[#allocation7] sm:$0xff] }
  0x19   :  { %252 = vmatpush.bf16.msra.mxu1 %v488_v3  ;;  %v497_v17 = vld [vmem:[#allocation8 + $0x38] sm:$0xff]  ;;  %v496_v18 = vld [vmem:[#allocation8 + $0x30] sm:$0xff]  ;;  %v495_v19 = vld [vmem:[#allocation8 + $0x28] sm:$0xff] }
  0x1a   :  { %336 = vmatpush.bf16.msra.mxu2 %v497_v17  ;;  %v494_v20 = vld [vmem:[#allocation8 + $0x20] sm:$0xff]  ;;  %v507_v22 = vld [vmem:[%s713_s2] ss:$0 sm:$0xff]  ;;  %v492_v30 = vld [vmem:[#allocation8 + $0x10] sm:$0xff] }
  0x1b   :  { %v493_v29 = vld [vmem:[#allocation8 + $0x18] sm:$0xff]  ;;  %v491_v31 = vld [vmem:[#allocation8 + $0x8] sm:$0xff]  ;;  %v490_v32 = vld [vmem:[#allocation8] sm:$0xff] }
  0x1c   :  { %168 = vmatpush.bf16.msra.mxu0 %v479_v4  ;;  %v508_v34 = vld [vmem:[%s715_s4] ss:$0 sm:$0xff]  ;;  %s358_s4 = sshll.u32 %s718_s7, 4  ;;  %s359_s4 = int_to_ptr.hbm [resolvable:$true] %s358_s4 }
  0x1d   :  { %253 = vmatpush.bf16.msra.mxu1 %v487_v5  ;;  %v509_v41 = vld [vmem:[%s717_s6] ss:$0 sm:$0xff] }
  0x1e   :  { %337 = vmatpush.bf16.msra.mxu2 %v496_v18 }
  0x20   :  { %169 = vmatpush.bf16.msra.mxu0 %v478_v6 }
  0x21   :  { %254 = vmatpush.bf16.msra.mxu1 %v486_v7 }
  0x22   :  { %338 = vmatpush.bf16.msra.mxu2 %v495_v19 }
  0x24   :  { %170 = vmatpush.bf16.msra.mxu0 %v477_v8 }
  0x25   :  { %255 = vmatpush.bf16.msra.mxu1 %v485_v13 }
  0x26   :  { %339 = vmatpush.bf16.msra.mxu2 %v494_v20 }
  0x28   :  { %171 = vmatpush.bf16.msra.mxu0 %v476_v9 }
  0x29   :  { %256 = vmatpush.bf16.msra.mxu1 %v484_v14 }
  0x2a   :  { %340 = vmatpush.bf16.msra.mxu2 %v493_v29 }
  0x2c   :  { %172 = vmatpush.bf16.msra.mxu0 %v475_v10 }
  0x2d   :  { %257 = vmatpush.bf16.msra.mxu1 %v483_v15 }
  0x2e   :  { %341 = vmatpush.bf16.msra.mxu2 %v492_v30 }
  0x30   :  { %173 = vmatpush.bf16.msra.mxu0 %v474_v11 }
  0x31   :  { %258 = vmatpush.bf16.msra.mxu1 %v482_v16 }
  0x32   :  { %342 = vmatpush.bf16.msra.mxu2 %v491_v31 }
  0x33   :  { %174 = vmatmul.bf16.vlgmr.msra.gmra.mxu0 %v473_v12 }
  0x36   :  { %343 = vmatpush.bf16.msra.mxu2 %v490_v32 }
  0xb0   :  { %v175_v21 = vpop.f32.mrf.mxu0 }
  0xb1   :  { %v176_v23 = vadd.f32 %v507_v22, %v175_v21 }
  0xb3   :  { %v180_v26 = vmax.f32 %v176_v23, 0.0 }
  0xb8   :  { %v177_v24 = vpop.f32.mrf.mxu0 }
  0xb9   :  { %v178_v25 = vadd.f32 %v507_v22, %v177_v24 }
  0xbb   :  { %v181_v27 = vmax.f32 %v178_v25, 0.0 }
  0xbd   :  { %v182_v28 = vpack.c.bf16 %v181_v27, %v180_v26 }
  0xbf   :  { %259 = vmatmul.bf16.vlgmr.msra.gmra.mxu1 %v182_v28 }
 0x13c   :  { %v260_v33 = vpop.f32.mrf.mxu1 }
 0x13d   :  { %v261_v35 = vadd.f32 %v508_v34, %v260_v33 }
 0x13f   :  { %v265_v38 = vmax.f32 %v261_v35, 0.0 }
 0x144   :  { %v262_v36 = vpop.f32.mrf.mxu1 }
 0x145   :  { %v263_v37 = vadd.f32 %v508_v34, %v262_v36 }
 0x147   :  { %v266_v39 = vmax.f32 %v263_v37, 0.0 }
 0x149   :  { %v267_v40 = vpack.c.bf16 %v266_v39, %v265_v38 }
 0x14b   :  { %344 = vmatmul.bf16.vlgmr.msra.gmra.mxu2 %v267_v40 }
 0x1ce   :  { %v345_v42 = vpop.f32.mrf.mxu2 }
 0x1cf   :  { %v346_v43 = vadd.f32 %v509_v41, %v345_v42 }
 0x1d1   :  { %350 = vst [vmem:[#allocation10] sm:$0xff] %v346_v43 }
 0x1d6   :  { %v347_v44 = vpop.f32.mrf.mxu2 }
 0x1d7   :  { %v348_v45 = vadd.f32 %v509_v41, %v347_v44 }
 0x1d9   :  { %351 = vst [vmem:[#allocation10 + $0x8] sm:$0xff] %v348_v45 }
 0x1da   :  { %364 = dma.vmem_to_hbm [thread:$0]  %s357_s25, 256, %s359_s4, [#allocation4], %s645_s28, %s645_s28, %s646_s29  }
 0x1db   :  { %636 = dma.done.wait [#allocation4], 256  }
 0x1dc   :  { %637 = vsyncadd [#allocation4], 4294967040 }
 0x1dd   :  { %369 = vsyncpa [#allocation3], 1 }
 0x1de   :  { %370 = vsyncpa [#allocation6], 1 }
 0x1df   :  { %371 = vsyncpa [#allocation9], 1 }
 0x1e0   :  { %372 = vsyncpa [#allocation4], 1 }

</bundles_post_ra>
